<compile_context>
chip_gen: v5e
topology: v5e:2x2
jax: 0.10.0
libtpu: 0.0.40
codegen_flags: <defaults>
</compile_context>

<pallas_src>
import numpy as np
import jax
import jax.numpy as jnp
from jax.experimental import pallas as pl
from jax.experimental.pallas import tpu as pltpu

LANE = 128


def _round_up(x, m):
    return (x + m - 1) // m * m


def _edge_tiling(e):
    """Pick (padded_edge_count, row_tile) — tile is a multiple of 128 rows."""
    e_pad = _round_up(max(e, 1), LANE)
    if e_pad <= 1024:
        return e_pad, e_pad
    return _round_up(e, 1024), 1024


# ----------------------------- Pallas kernels --------------------------------

def _node_kernel(x_ref, ew_ref, eb_ref,
                 w1s1_ref, w1d1_ref, w1s2_ref, w1d2_ref,
                 b11_ref, b12_ref,
                 p1s_ref, p1d_ref, p2s_ref, p2d_ref):
    """Fused atom encoder + per-node first projector layer (both heads, src/dst halves).

    x      = node_feats @ enc_w + enc_b                       (MXU, f32 accum)
    p1_src = x @ W1_src(head1) + b1(head1)   p1_dst = x @ W1_dst(head1)
    p2_src = x @ W1_src(head2) + b1(head2)   p2_dst = x @ W1_dst(head2)
    """
    x = jnp.dot(x_ref[...], ew_ref[...], preferred_element_type=jnp.float32) + eb_ref[...]
    xb = x.astype(jnp.bfloat16)
    p1s = jnp.dot(xb, w1s1_ref[...], preferred_element_type=jnp.float32) + b11_ref[...]
    p1d = jnp.dot(xb, w1d1_ref[...], preferred_element_type=jnp.float32)
    p2s = jnp.dot(xb, w1s2_ref[...], preferred_element_type=jnp.float32) + b12_ref[...]
    p2d = jnp.dot(xb, w1d2_ref[...], preferred_element_type=jnp.float32)
    p1s_ref[...] = p1s.astype(p1s_ref.dtype)
    p1d_ref[...] = p1d.astype(p1d_ref.dtype)
    p2s_ref[...] = p2s.astype(p2s_ref.dtype)
    p2d_ref[...] = p2d.astype(p2d_ref.dtype)


def _edge_head_kernel(gsrc_ref, gdst_ref, w2_ref, o_ref):
    """Per-edge second layer: relu(p_src[i] + p_dst[j]) . w2 (bias b1 folded into p_src)."""
    h = gsrc_ref[...].astype(jnp.float32) + gdst_ref[...].astype(jnp.float32)
    h = jnp.maximum(h, 0.0)
    # VPU multiply + XLU lane reduce; avoids a K=32 / N=1 MXU matmul.
    o_ref[...] = jnp.sum(h * w2_ref[...], axis=-1, keepdims=True)


# ----------------------------- pallas_call wrappers ---------------------------

def node_projections(nf_p, enc_w, enc_b, w1s1, w1d1, w1s2, w1d2, b11, b12, *, tile_n):
    n_pad, f_pad = nf_p.shape
    hid = w1s1.shape[1]
    n_tiles = n_pad // tile_n

    def full(a):
        return pl.BlockSpec(a.shape, lambda i: (0,) * a.ndim)

    row_in = pl.BlockSpec((tile_n, f_pad), lambda i: (i, 0))
    row_out = pl.BlockSpec((tile_n, hid), lambda i: (i, 0))
    out_sd = jax.ShapeDtypeStruct((n_pad, hid), jnp.bfloat16)

    return pl.pallas_call(
        _node_kernel,
        out_shape=(out_sd,) * 4,
        grid=(n_tiles,),
        in_specs=[row_in, full(enc_w), full(enc_b),
                  full(w1s1), full(w1d1), full(w1s2), full(w1d2),
                  full(b11), full(b12)],
        out_specs=(row_out,) * 4,
        compiler_params=pltpu.CompilerParams(dimension_semantics=("parallel",)),
    )(nf_p, enc_w, enc_b, w1s1, w1d1, w1s2, w1d2, b11, b12)


def edge_head(g_src, g_dst, w2_row, *, tile_e):
    e_pad, hid = g_src.shape
    n_tiles = e_pad // tile_e
    return pl.pallas_call(
        _edge_head_kernel,
        out_shape=jax.ShapeDtypeStruct((e_pad, 1), jnp.float32),
        grid=(n_tiles,),
        in_specs=[
            pl.BlockSpec((tile_e, hid), lambda i: (i, 0)),
            pl.BlockSpec((tile_e, hid), lambda i: (i, 0)),
            pl.BlockSpec((1, hid), lambda i: (0, 0)),
        ],
        out_specs=pl.BlockSpec((tile_e, 1), lambda i: (i, 0)),
        compiler_params=pltpu.CompilerParams(dimension_semantics=("parallel",)),
    )(g_src, g_dst, w2_row)


# ----------------------------- EdgeSelector -----------------------------------

class EdgeSelectorPallas:
    def __init__(self, key, feat_dim, in_dim, hid_size, ensemble=1,
                 use_deletion_head=True, directed_sampling=False):
        assert ensemble == 1, "kernel specialization for the configured ensemble=1"
        ks = jax.random.split(key, 10)

        def init(k, shape, fan_in):
            return jax.random.normal(k, shape, jnp.float32) / np.sqrt(fan_in)

        # ---- f32 master parameters (same parametrization as the PyTorch module) ----
        self.enc_w = init(ks[0], (feat_dim, in_dim), feat_dim)
        self.enc_b = 0.1 * jax.random.normal(ks[1], (in_dim,), jnp.float32)
        d2 = in_dim * 2
        self.p1_w1 = init(ks[2], (d2, hid_size), d2)
        self.p1_b1 = 0.1 * jax.random.normal(ks[3], (hid_size,), jnp.float32)
        self.p1_w2 = init(ks[4], (hid_size, ensemble), hid_size)
        self.p1_b2 = 0.1 * jax.random.normal(ks[5], (ensemble,), jnp.float32)

        self.use_deletion_head = use_deletion_head
        self.directed_sampling = directed_sampling
        if use_deletion_head:
            self.p2_w1 = init(ks[6], (d2, hid_size), d2)
            self.p2_b1 = 0.1 * jax.random.normal(ks[7], (hid_size,), jnp.float32)
            self.p2_w2 = init(ks[8], (hid_size, ensemble), hid_size)
            self.p2_b2 = 0.1 * jax.random.normal(ks[9], (ensemble,), jnp.float32)

        # ---- lane-padded bf16 kernel parameters ----
        self.feat_dim, self.in_dim, self.hid = feat_dim, in_dim, hid_size
        self.f_pad = _round_up(feat_dim, LANE)
        self.in_pad = _round_up(in_dim, LANE)
        self.hid_pad = _round_up(hid_size, LANE)

        def pad2(w, r, c, dtype):
            return jnp.zeros((r, c), dtype).at[:w.shape[0], :w.shape[1]].set(w.astype(dtype))

        self.k_enc_w = pad2(self.enc_w, self.f_pad, self.in_pad, jnp.bfloat16)
        self.k_enc_b = pad2(self.enc_b[None, :], 1, self.in_pad, jnp.float32)
        self.k_w1s1 = pad2(self.p1_w1[:in_dim], self.in_pad, self.hid_pad, jnp.bfloat16)
        self.k_w1d1 = pad2(self.p1_w1[in_dim:], self.in_pad, self.hid_pad, jnp.bfloat16)
        self.k_b11 = pad2(self.p1_b1[None, :], 1, self.hid_pad, jnp.float32)
        self.k_w2r1 = pad2(self.p1_w2[:, :1].T, 1, self.hid_pad, jnp.float32)
        if use_deletion_head:
            self.k_w1s2 = pad2(self.p2_w1[:in_dim], self.in_pad, self.hid_pad, jnp.bfloat16)
            self.k_w1d2 = pad2(self.p2_w1[in_dim:], self.in_pad, self.hid_pad, jnp.bfloat16)
            self.k_b12 = pad2(self.p2_b1[None, :], 1, self.hid_pad, jnp.float32)
            self.k_w2r2 = pad2(self.p2_w2[:, :1].T, 1, self.hid_pad, jnp.float32)
        else:
            self.k_w1s2 = jnp.zeros_like(self.k_w1s1)
            self.k_w1d2 = jnp.zeros_like(self.k_w1d1)
            self.k_b12 = jnp.zeros_like(self.k_b11)
            self.k_w2r2 = jnp.zeros_like(self.k_w2r1)

        # jittable device-side forward (everything except the dynamic-shape row filter)
        self._fwd = jax.jit(self._forward_core)

    # ---------------- device-side core (jitted, static shapes) ----------------
    def _forward_core(self, node_feats, edge_candidate, num_edge_candidate, node_slice,
                      ei_src, ei_dst):
        n, f = node_feats.shape
        tile_n = min(256, _round_up(max(n, 1), 16))
        n_pad = _round_up(n, tile_n)
        nf = jnp.zeros((n_pad, self.f_pad), jnp.bfloat16)
        nf = nf.at[:n, :f].set(node_feats.astype(jnp.bfloat16))

        # Fused encoder + per-node first-layer projections (single Pallas launch).
        # x = gnn(x, ...) -> GNN_Placeholder (gnn_layer == 0): identity.
        p1s, p1d, p2s, p2d = node_projections(
            nf, self.k_enc_w, self.k_enc_b,
            self.k_w1s1, self.k_w1d1, self.k_w1s2, self.k_w1d2,
            self.k_b11, self.k_b12, tile_n=tile_n)

        # edge_candidate_idx = edge_candidate + repeat_interleave(slice, num_edge_candidate)
        edge_rel = node_slice[:-1]
        e1 = edge_candidate.shape[0]
        offsets = jnp.repeat(edge_rel, num_edge_candidate, total_repeat_length=e1)
        cand_idx = edge_candidate + offsets[:, None]

        # ---- select head (candidate edges) ----
        e1_pad, tile_e1 = _edge_tiling(e1)
        src = jnp.zeros((e1_pad,), jnp.int32).at[:e1].set(cand_idx[:, 0].astype(jnp.int32))
        dst = jnp.zeros((e1_pad,), jnp.int32).at[:e1].set(cand_idx[:, 1].astype(jnp.int32))
        g_src = jnp.take(p1s, src, axis=0)   # (e1_pad, hid_pad) bf16 rows (not 2*in_dim f32)
        g_dst = jnp.take(p1d, dst, axis=0)
        sel = edge_head(g_src, g_dst, self.k_w2r1, tile_e=tile_e1)[:e1] + self.p1_b2[None, :]

        # ---- deletion head (existing edges; computed for all, filtered on host) ----
        dele = None
        if self.use_deletion_head:
            e2 = ei_src.shape[0]
            e2_pad, tile_e2 = _edge_tiling(e2)
            s2 = jnp.zeros((e2_pad,), jnp.int32).at[:e2].set(ei_src)
            d2 = jnp.zeros((e2_pad,), jnp.int32).at[:e2].set(ei_dst)
            g2s = jnp.take(p2s, s2, axis=0)
            g2d = jnp.take(p2d, d2, axis=0)
            dele = edge_head(g2s, g2d, self.k_w2r2, tile_e=tile_e2)[:e2] + self.p2_b2[None, :]

        return sel, dele, cand_idx

    # ---------------- public forward ----------------
    def __call__(self, node_feats, edge_index, edge_candidate, num_edge_candidate, node_slice):
        ei_src = edge_index[0].astype(jnp.int32)
        ei_dst = edge_index[1].astype(jnp.int32)
        sel, dele_all, cand_idx = self._fwd(node_feats, edge_candidate, num_edge_candidate,
                                            node_slice, ei_src, ei_dst)
        dele = dele_all
        if self.use_deletion_head and not self.directed_sampling:
            # Dynamic-shape boolean row filter: per-edge logits depend only on that edge's
            # endpoints, so filtering the final logits equals running the projector on the
            # filtered edge set. Host glue happens only AFTER all device work is dispatched.
            keep = np.asarray(ei_src <= ei_dst)
            dele = jnp.asarray(np.asarray(dele_all)[keep])
        return sel, dele, cand_idx


# ----------------------------- reference (plain JAX, f32) ----------------------

def _reference(model, node_feats, edge_index, edge_candidate, num_edge_candidate, node_slice):
    x = node_feats @ model.enc_w + model.enc_b
    edge_rel = node_slice[:-1]
    offsets = jnp.repeat(edge_rel, num_edge_candidate, total_repeat_length=edge_candidate.shape[0])
    idx = edge_candidate + offsets[:, None]
    cands = jnp.concatenate([x[idx[:, 0]], x[idx[:, 1]]], axis=1)

    def mlp(z, w1, b1, w2, b2):
        return jnp.maximum(z @ w1 + b1, 0.0) @ w2 + b2

    sel = mlp(cands, model.p1_w1, model.p1_b1, model.p1_w2, model.p1_b2)
    dele = None
    if model.use_deletion_head:
        ei = np.asarray(edge_index)
        if not model.directed_sampling:
            ei = ei[:, ei[0] <= ei[1]]
        cur = jnp.concatenate([x[ei[0]], x[ei[1]]], axis=1)
        dele = mlp(cur, model.p2_w1, model.p2_b1, model.p2_w2, model.p2_b2)
    return sel, dele, idx


# ----------------------------- main --------------------------------------------

if __name__ == "__main__":
    key = jax.random.PRNGKey(0)
    k_feat, k_param = jax.random.split(key)

    feat_dim, in_dim, hid_size, ensemble = 16, 32, 32, 1
    nodes_per_graph = [16, 16]
    N = sum(nodes_per_graph)

    node_feats = jax.random.normal(k_feat, (N, feat_dim), jnp.float32)
    node_slice = jnp.array([0, nodes_per_graph[0], N], dtype=jnp.int32)  # data._slice_dict['x']

    rng = np.random.RandomState(0)
    # per-graph (local-index) candidate edges
    num_edge_candidate = jnp.array([6, 10], dtype=jnp.int32)
    cand = np.concatenate([rng.randint(0, nodes_per_graph[0], size=(6, 2)),
                           rng.randint(0, nodes_per_graph[1], size=(10, 2))], axis=0)
    edge_candidate = jnp.asarray(cand, dtype=jnp.int32)

    # existing (global-index) edges, stored in both directions
    und = rng.randint(0, N, size=(2, 12))
    edge_index = jnp.asarray(np.concatenate([und, und[::-1]], axis=1), dtype=jnp.int32)

    model = EdgeSelectorPallas(k_param, feat_dim, in_dim, hid_size, ensemble=ensemble,
                               use_deletion_head=True, directed_sampling=False)

    sel, dele, idx = model(node_feats, edge_index, edge_candidate,
                           num_edge_candidate, node_slice)
    jax.block_until_ready((sel, dele, idx))

    sel_ref, dele_ref, idx_ref = _reference(
        model, node_feats, edge_index, edge_candidate, num_edge_candidate, node_slice)
    # bf16 weights/activations in the kernels vs f32 reference -> loose tolerance
    np.testing.assert_allclose(np.asarray(sel), np.asarray(sel_ref), rtol=5e-2, atol=5e-2)
    np.testing.assert_allclose(np.asarray(dele), np.asarray(dele_ref), rtol=5e-2, atol=5e-2)
    np.testing.assert_array_equal(np.asarray(idx), np.asarray(idx_ref))

    print("KERNEL_OK")
</pallas_src>

<mosaic_0001>
module attributes {stable_mosaic.version = 11 : i64} {
  func.func @_node_kernel(%arg0: i32, %arg1: memref<32x128xbf16, #tpu.memory_space<vmem>>, %arg2: memref<128x128xbf16, #tpu.memory_space<vmem>>, %arg3: memref<1x128xf32, #tpu.memory_space<vmem>>, %arg4: memref<128x128xbf16, #tpu.memory_space<vmem>>, %arg5: memref<128x128xbf16, #tpu.memory_space<vmem>>, %arg6: memref<128x128xbf16, #tpu.memory_space<vmem>>, %arg7: memref<128x128xbf16, #tpu.memory_space<vmem>>, %arg8: memref<1x128xf32, #tpu.memory_space<vmem>>, %arg9: memref<1x128xf32, #tpu.memory_space<vmem>>, %arg10: memref<32x128xbf16, #tpu.memory_space<vmem>>, %arg11: memref<32x128xbf16, #tpu.memory_space<vmem>>, %arg12: memref<32x128xbf16, #tpu.memory_space<vmem>>, %arg13: memref<32x128xbf16, #tpu.memory_space<vmem>>) attributes {dimension_semantics = [#tpu.dimension_semantics<parallel>], iteration_bounds = array<i64: 1>, scalar_prefetch = 0 : i64, scratch_operands = 0 : i64, tpu.core_type = #tpu.core_type<tc>, window_params = [{transform_indices = @transform_0, window_bounds = array<i64: 32, 128>}, {pipeline_mode = #tpu.pipeline_mode<synchronous>, transform_indices = @transform_1, window_bounds = array<i64: 128, 128>}, {pipeline_mode = #tpu.pipeline_mode<synchronous>, transform_indices = @transform_2, window_bounds = array<i64: 1, 128>}, {pipeline_mode = #tpu.pipeline_mode<synchronous>, transform_indices = @transform_3, window_bounds = array<i64: 128, 128>}, {pipeline_mode = #tpu.pipeline_mode<synchronous>, transform_indices = @transform_4, window_bounds = array<i64: 128, 128>}, {pipeline_mode = #tpu.pipeline_mode<synchronous>, transform_indices = @transform_5, window_bounds = array<i64: 128, 128>}, {pipeline_mode = #tpu.pipeline_mode<synchronous>, transform_indices = @transform_6, window_bounds = array<i64: 128, 128>}, {pipeline_mode = #tpu.pipeline_mode<synchronous>, transform_indices = @transform_7, window_bounds = array<i64: 1, 128>}, {pipeline_mode = #tpu.pipeline_mode<synchronous>, transform_indices = @transform_8, window_bounds = array<i64: 1, 128>}, {transform_indices = @transform_9, window_bounds = array<i64: 32, 128>}, {transform_indices = @transform_10, window_bounds = array<i64: 32, 128>}, {transform_indices = @transform_11, window_bounds = array<i64: 32, 128>}, {transform_indices = @transform_12, window_bounds = array<i64: 32, 128>}]} {
    %c0 = arith.constant 0 : index
    %c0_0 = arith.constant 0 : index
    %0 = vector.load %arg1[%c0, %c0_0] : memref<32x128xbf16, #tpu.memory_space<vmem>>, vector<32x128xbf16>
    %c0_1 = arith.constant 0 : index
    %c0_2 = arith.constant 0 : index
    %1 = vector.load %arg2[%c0_1, %c0_2] : memref<128x128xbf16, #tpu.memory_space<vmem>>, vector<128x128xbf16>
    %cst = arith.constant dense<0.000000e+00> : vector<32x128xf32>
    %2 = tpu.matmul %0, %1, %cst {dimension_numbers = #tpu.dot_dimension_numbers<[1], [0], [0], [1], [0, 0, 1, 1], [], []>} : vector<32x128xbf16>, vector<128x128xbf16>, vector<32x128xf32> -> vector<32x128xf32>
    %c0_3 = arith.constant 0 : index
    %c0_4 = arith.constant 0 : index
    %3 = vector.load %arg3[%c0_3, %c0_4] : memref<1x128xf32, #tpu.memory_space<vmem>>, vector<1x128xf32>
    %4 = vector.broadcast %3 : vector<1x128xf32> to vector<32x128xf32>
    %5 = arith.addf %2, %4 : vector<32x128xf32>
    %6 = arith.truncf %5 : vector<32x128xf32> to vector<32x128xbf16>
    %c0_5 = arith.constant 0 : index
    %c0_6 = arith.constant 0 : index
    %7 = vector.load %arg4[%c0_5, %c0_6] : memref<128x128xbf16, #tpu.memory_space<vmem>>, vector<128x128xbf16>
    %cst_7 = arith.constant dense<0.000000e+00> : vector<32x128xf32>
    %8 = tpu.matmul %6, %7, %cst_7 {dimension_numbers = #tpu.dot_dimension_numbers<[1], [0], [0], [1], [0, 0, 1, 1], [], []>} : vector<32x128xbf16>, vector<128x128xbf16>, vector<32x128xf32> -> vector<32x128xf32>
    %c0_8 = arith.constant 0 : index
    %c0_9 = arith.constant 0 : index
    %9 = vector.load %arg8[%c0_8, %c0_9] : memref<1x128xf32, #tpu.memory_space<vmem>>, vector<1x128xf32>
    %10 = vector.broadcast %9 : vector<1x128xf32> to vector<32x128xf32>
    %11 = arith.addf %8, %10 : vector<32x128xf32>
    %c0_10 = arith.constant 0 : index
    %c0_11 = arith.constant 0 : index
    %12 = vector.load %arg5[%c0_10, %c0_11] : memref<128x128xbf16, #tpu.memory_space<vmem>>, vector<128x128xbf16>
    %cst_12 = arith.constant dense<0.000000e+00> : vector<32x128xf32>
    %13 = tpu.matmul %6, %12, %cst_12 {dimension_numbers = #tpu.dot_dimension_numbers<[1], [0], [0], [1], [0, 0, 1, 1], [], []>} : vector<32x128xbf16>, vector<128x128xbf16>, vector<32x128xf32> -> vector<32x128xf32>
    %c0_13 = arith.constant 0 : index
    %c0_14 = arith.constant 0 : index
    %14 = vector.load %arg6[%c0_13, %c0_14] : memref<128x128xbf16, #tpu.memory_space<vmem>>, vector<128x128xbf16>
    %cst_15 = arith.constant dense<0.000000e+00> : vector<32x128xf32>
    %15 = tpu.matmul %6, %14, %cst_15 {dimension_numbers = #tpu.dot_dimension_numbers<[1], [0], [0], [1], [0, 0, 1, 1], [], []>} : vector<32x128xbf16>, vector<128x128xbf16>, vector<32x128xf32> -> vector<32x128xf32>
    %c0_16 = arith.constant 0 : index
    %c0_17 = arith.constant 0 : index
    %16 = vector.load %arg9[%c0_16, %c0_17] : memref<1x128xf32, #tpu.memory_space<vmem>>, vector<1x128xf32>
    %17 = vector.broadcast %16 : vector<1x128xf32> to vector<32x128xf32>
    %18 = arith.addf %15, %17 : vector<32x128xf32>
    %c0_18 = arith.constant 0 : index
    %c0_19 = arith.constant 0 : index
    %19 = vector.load %arg7[%c0_18, %c0_19] : memref<128x128xbf16, #tpu.memory_space<vmem>>, vector<128x128xbf16>
    %cst_20 = arith.constant dense<0.000000e+00> : vector<32x128xf32>
    %20 = tpu.matmul %6, %19, %cst_20 {dimension_numbers = #tpu.dot_dimension_numbers<[1], [0], [0], [1], [0, 0, 1, 1], [], []>} : vector<32x128xbf16>, vector<128x128xbf16>, vector<32x128xf32> -> vector<32x128xf32>
    %21 = arith.truncf %11 : vector<32x128xf32> to vector<32x128xbf16>
    %c0_21 = arith.constant 0 : index
    %c0_22 = arith.constant 0 : index
    %22 = vector.load %arg10[%c0_21, %c0_22] : memref<32x128xbf16, #tpu.memory_space<vmem>>, vector<32x128xbf16>
    tpu.vector_store %arg10[%c0_21, %c0_22], %21 {strides = array<i32>} : memref<32x128xbf16, #tpu.memory_space<vmem>>, vector<32x128xbf16>,
    %23 = arith.truncf %13 : vector<32x128xf32> to vector<32x128xbf16>
    %c0_23 = arith.constant 0 : index
    %c0_24 = arith.constant 0 : index
    %24 = vector.load %arg11[%c0_23, %c0_24] : memref<32x128xbf16, #tpu.memory_space<vmem>>, vector<32x128xbf16>
    tpu.vector_store %arg11[%c0_23, %c0_24], %23 {strides = array<i32>} : memref<32x128xbf16, #tpu.memory_space<vmem>>, vector<32x128xbf16>,
    %25 = arith.truncf %18 : vector<32x128xf32> to vector<32x128xbf16>
    %c0_25 = arith.constant 0 : index
    %c0_26 = arith.constant 0 : index
    %26 = vector.load %arg12[%c0_25, %c0_26] : memref<32x128xbf16, #tpu.memory_space<vmem>>, vector<32x128xbf16>
    tpu.vector_store %arg12[%c0_25, %c0_26], %25 {strides = array<i32>} : memref<32x128xbf16, #tpu.memory_space<vmem>>, vector<32x128xbf16>,
    %27 = arith.truncf %20 : vector<32x128xf32> to vector<32x128xbf16>
    %c0_27 = arith.constant 0 : index
    %c0_28 = arith.constant 0 : index
    %28 = vector.load %arg13[%c0_27, %c0_28] : memref<32x128xbf16, #tpu.memory_space<vmem>>, vector<32x128xbf16>
    tpu.vector_store %arg13[%c0_27, %c0_28], %27 {strides = array<i32>} : memref<32x128xbf16, #tpu.memory_space<vmem>>, vector<32x128xbf16>,
    return
  }
  func.func @transform_0(%arg0: i32) -> (i32, i32) {
    %c0_i32 = arith.constant 0 : i32
    %c0_i32_0 = arith.constant 0 : i32
    return %arg0, %c0_i32 : i32, i32
  }
  func.func @transform_1(%arg0: i32) -> (i32, i32) {
    %c0_i32 = arith.constant 0 : i32
    %c0_i32_0 = arith.constant 0 : i32
    %c0_i32_1 = arith.constant 0 : i32
    return %c0_i32, %c0_i32_0 : i32, i32
  }
  func.func @transform_2(%arg0: i32) -> (i32, i32) {
    %c0_i32 = arith.constant 0 : i32
    %c0_i32_0 = arith.constant 0 : i32
    %c0_i32_1 = arith.constant 0 : i32
    return %c0_i32, %c0_i32_0 : i32, i32
  }
  func.func @transform_3(%arg0: i32) -> (i32, i32) {
    %c0_i32 = arith.constant 0 : i32
    %c0_i32_0 = arith.constant 0 : i32
    %c0_i32_1 = arith.constant 0 : i32
    return %c0_i32, %c0_i32_0 : i32, i32
  }
  func.func @transform_4(%arg0: i32) -> (i32, i32) {
    %c0_i32 = arith.constant 0 : i32
    %c0_i32_0 = arith.constant 0 : i32
    %c0_i32_1 = arith.constant 0 : i32
    return %c0_i32, %c0_i32_0 : i32, i32
  }
  func.func @transform_5(%arg0: i32) -> (i32, i32) {
    %c0_i32 = arith.constant 0 : i32
    %c0_i32_0 = arith.constant 0 : i32
    %c0_i32_1 = arith.constant 0 : i32
    return %c0_i32, %c0_i32_0 : i32, i32
  }
  func.func @transform_6(%arg0: i32) -> (i32, i32) {
    %c0_i32 = arith.constant 0 : i32
    %c0_i32_0 = arith.constant 0 : i32
    %c0_i32_1 = arith.constant 0 : i32
    return %c0_i32, %c0_i32_0 : i32, i32
  }
  func.func @transform_7(%arg0: i32) -> (i32, i32) {
    %c0_i32 = arith.constant 0 : i32
    %c0_i32_0 = arith.constant 0 : i32
    %c0_i32_1 = arith.constant 0 : i32
    return %c0_i32, %c0_i32_0 : i32, i32
  }
  func.func @transform_8(%arg0: i32) -> (i32, i32) {
    %c0_i32 = arith.constant 0 : i32
    %c0_i32_0 = arith.constant 0 : i32
    %c0_i32_1 = arith.constant 0 : i32
    return %c0_i32, %c0_i32_0 : i32, i32
  }
  func.func @transform_9(%arg0: i32) -> (i32, i32) {
    %c0_i32 = arith.constant 0 : i32
    %c0_i32_0 = arith.constant 0 : i32
    return %arg0, %c0_i32 : i32, i32
  }
  func.func @transform_10(%arg0: i32) -> (i32, i32) {
    %c0_i32 = arith.constant 0 : i32
    %c0_i32_0 = arith.constant 0 : i32
    return %arg0, %c0_i32 : i32, i32
  }
  func.func @transform_11(%arg0: i32) -> (i32, i32) {
    %c0_i32 = arith.constant 0 : i32
    %c0_i32_0 = arith.constant 0 : i32
    return %arg0, %c0_i32 : i32, i32
  }
  func.func @transform_12(%arg0: i32) -> (i32, i32) {
    %c0_i32 = arith.constant 0 : i32
    %c0_i32_0 = arith.constant 0 : i32
    return %arg0, %c0_i32 : i32, i32
  }
}

module attributes {stable_mosaic.version = 11 : i64} {
  func.func @_edge_head_kernel(%arg0: i32, %arg1: memref<128x128xbf16, #tpu.memory_space<vmem>>, %arg2: memref<128x128xbf16, #tpu.memory_space<vmem>>, %arg3: memref<1x128xf32, #tpu.memory_space<vmem>>, %arg4: memref<128x1xf32, #tpu.memory_space<vmem>>) attributes {dimension_semantics = [#tpu.dimension_semantics<parallel>], iteration_bounds = array<i64: 1>, scalar_prefetch = 0 : i64, scratch_operands = 0 : i64, tpu.core_type = #tpu.core_type<tc>, window_params = [{transform_indices = @transform_0, window_bounds = array<i64: 128, 128>}, {transform_indices = @transform_1, window_bounds = array<i64: 128, 128>}, {pipeline_mode = #tpu.pipeline_mode<synchronous>, transform_indices = @transform_2, window_bounds = array<i64: 1, 128>}, {transform_indices = @transform_3, window_bounds = array<i64: 128, 1>}]} {
    %c0 = arith.constant 0 : index
    %c0_0 = arith.constant 0 : index
    %0 = vector.load %arg1[%c0, %c0_0] : memref<128x128xbf16, #tpu.memory_space<vmem>>, vector<128x128xbf16>
    %1 = arith.extf %0 : vector<128x128xbf16> to vector<128x128xf32>
    %c0_1 = arith.constant 0 : index
    %c0_2 = arith.constant 0 : index
    %2 = vector.load %arg2[%c0_1, %c0_2] : memref<128x128xbf16, #tpu.memory_space<vmem>>, vector<128x128xbf16>
    %3 = arith.extf %2 : vector<128x128xbf16> to vector<128x128xf32>
    %4 = arith.addf %1, %3 : vector<128x128xf32>
    %cst = arith.constant 0.000000e+00 : f32
    %5 = vector.broadcast %cst : f32 to vector<128x128xf32>
    %6 = arith.maximumf %4, %5 : vector<128x128xf32>
    %c0_3 = arith.constant 0 : index
    %c0_4 = arith.constant 0 : index
    %7 = vector.load %arg3[%c0_3, %c0_4] : memref<1x128xf32, #tpu.memory_space<vmem>>, vector<1x128xf32>
    %8 = vector.broadcast %7 : vector<1x128xf32> to vector<128x128xf32>
    %9 = arith.mulf %6, %8 : vector<128x128xf32>
    %cst_5 = arith.constant dense<0.000000e+00> : vector<128xf32>
    %10 = vector.multi_reduction <add>, %9, %cst_5 [1] : vector<128x128xf32> to vector<128xf32>
    %11 = vector.shape_cast %10 : vector<128xf32> to vector<128x1xf32>
    %c0_6 = arith.constant 0 : index
    %c0_7 = arith.constant 0 : index
    %12 = vector.load %arg4[%c0_6, %c0_7] : memref<128x1xf32, #tpu.memory_space<vmem>>, vector<128x1xf32>
    tpu.vector_store %arg4[%c0_6, %c0_7], %11 {strides = array<i32>} : memref<128x1xf32, #tpu.memory_space<vmem>>, vector<128x1xf32>,
    return
  }
  func.func @transform_0(%arg0: i32) -> (i32, i32) {
    %c0_i32 = arith.constant 0 : i32
    %c0_i32_0 = arith.constant 0 : i32
    return %arg0, %c0_i32 : i32, i32
  }
  func.func @transform_1(%arg0: i32) -> (i32, i32) {
    %c0_i32 = arith.constant 0 : i32
    %c0_i32_0 = arith.constant 0 : i32
    return %arg0, %c0_i32 : i32, i32
  }
  func.func @transform_2(%arg0: i32) -> (i32, i32) {
    %c0_i32 = arith.constant 0 : i32
    %c0_i32_0 = arith.constant 0 : i32
    %c0_i32_1 = arith.constant 0 : i32
    return %c0_i32, %c0_i32_0 : i32, i32
  }
  func.func @transform_3(%arg0: i32) -> (i32, i32) {
    %c0_i32 = arith.constant 0 : i32
    %c0_i32_0 = arith.constant 0 : i32
    return %arg0, %c0_i32 : i32, i32
  }
}

</mosaic_0001>

<bundles_post_ra>
// kernel: _forward_core.4
= control target key start
LH: loop header
LB: loop body
LE: loop exit
PB: predicated region body
PF: predicated region fallthrough
CT: control target
= control target key end

     0   :  { %vm162_vm0 = vcmask 7168   ;;  %s415_s0 = inlined_call_operand.vmem [shape: bf16[128,128], index: 0, kind: input, shape index: {}]   ;;  %s416_s1 = inlined_call_operand.vmem [shape: bf16[128,128], index: 1, kind: input, shape index: {}]   ;;  %s417_s2 = inlined_call_operand.vmem [shape: f32[1,128], index: 2, kind: input, shape index: {}]   ;;  %s418_s3 = inlined_call_operand.vmem [shape: f32[128,1], index: 3, kind: output, shape index: {}]  }
   0x1   :  { %v184_v0 = vld [vmem:[%s415_s0] sm:$0xff]   ;;  %v248_v4 = vld [vmem:[%s415_s0 + $0x10] sm:$0xff]   ;;  %v247_v10 = vld [vmem:[%s415_s0 + $0x8] sm:$0xff]  }
   0x2   :  { %v216_v1 = vld [vmem:[%s416_s1] sm:$0xff]   ;;  %v185_v2 = vunpack.c.l.bf16 %v184_v0  ;;  %v255_v5 = vld [vmem:[%s416_s1 + $0x10] sm:$0xff]   ;;  %v186_v6 = vunpack.c.h.bf16 %v184_v0  ;;  %v193_v8 = vunpack.c.l.bf16 %v248_v4  ;;  %v254_v11 = vld [vmem:[%s416_s1 + $0x8] sm:$0xff]   ;;  %v194_v12 = vunpack.c.h.bf16 %v248_v4 }
   0x3   :  { %v217_v3 = vunpack.c.l.bf16 %v216_v1  ;;  %v218_v7 = vunpack.c.h.bf16 %v216_v1  ;;  %v225_v9 = vunpack.c.l.bf16 %v255_v5  ;;  %v226_v13 = vunpack.c.h.bf16 %v255_v5  ;;  %v303_v15 = vld [vmem:[%s417_s2] ss:$0 sm:$0xff]  ;;  %v249_v26 = vld [vmem:[%s415_s0 + $0x18] sm:$0xff]   ;;  %v251_v50 = vld [vmem:[%s415_s0 + $0x28] sm:$0xff]  }
   0x4   :  { %v189_v16 = vunpack.c.l.bf16 %v247_v10  ;;  %v221_v17 = vunpack.c.l.bf16 %v254_v11  ;;  %v190_v19 = vunpack.c.h.bf16 %v247_v10  ;;  %v222_v20 = vunpack.c.h.bf16 %v254_v11  ;;  %v256_v27 = vld [vmem:[%s416_s1 + $0x18] sm:$0xff]   ;;  %v250_v31 = vld [vmem:[%s415_s0 + $0x20] sm:$0xff]   ;;  %v258_v51 = vld [vmem:[%s416_s1 + $0x28] sm:$0xff]  }
   0x5   :  { %v78_v14 = vadd.f32 %v217_v3, %v185_v2  ;;  %v82_v18 = vadd.f32 %v225_v9, %v193_v8  ;;  %v79_v23 = vadd.f32 %v218_v7, %v186_v6  ;;  %v83_v25 = vadd.f32 %v226_v13, %v194_v12  ;;  %v257_v32 = vld [vmem:[%s416_s1 + $0x20] sm:$0xff]   ;;  %v252_v1 = vld [vmem:[%s415_s0 + $0x30] sm:$0xff]   ;;  %v253_v5 = vld [vmem:[%s415_s0 + $0x38] sm:$0xff]  }
   0x6   :  { %v80_v22 = vadd.f32 %v221_v17, %v189_v16  ;;  %v81_v30 = vadd.f32 %v222_v20, %v190_v19  ;;  %v197_v36 = vunpack.c.l.bf16 %v249_v26  ;;  %v229_v37 = vunpack.c.l.bf16 %v256_v27  ;;  %v259_v2 = vld [vmem:[%s416_s1 + $0x30] sm:$0xff]   ;;  %v260_v6 = vld [vmem:[%s416_s1 + $0x38] sm:$0xff]  }
   0x7   :  { %v94_v21 = vmax.f32 %v78_v14, 0.0  ;;  %v98_v24 = vmax.f32 %v82_v18, 0.0  ;;  %v95_v35 = vmax.f32 %v79_v23, 0.0  ;;  %v99_v38 = vmax.f32 %v83_v25, 0.0 }
   0x8   :  { %v96_v29 = vmax.f32 %v80_v22, 0.0  ;;  %v201_v39 = vunpack.c.l.bf16 %v250_v31  ;;  %v233_v40 = vunpack.c.l.bf16 %v257_v32  ;;  %v97_v41 = vmax.f32 %v81_v30, 0.0 }
   0x9   :  { %v114_v28 = vmul.f32 %v303_v15, %v94_v21  ;;  %v118_v33 = vmul.f32 %v303_v15, %v98_v24  ;;  %v198_v42 = vunpack.c.h.bf16 %v249_v26  ;;  %v230_v43 = vunpack.c.h.bf16 %v256_v27 }
   0xa   :  { %v116_v34 = vmul.f32 %v303_v15, %v96_v29  ;;  %v115_v44 = vmul.f32 %v303_v15, %v95_v35  ;;  %v84_v45 = vadd.f32 %v229_v37, %v197_v36  ;;  %v119_v46 = vmul.f32 %v303_v15, %v99_v38 }
   0xb   :  { %130 = vadd.xlane.f32.xlu0 %v114_v28  ;;  %138 = vadd.xlane.f32.xlu2 %v118_v33  ;;  %v86_v47 = vadd.f32 %v233_v40, %v201_v39  ;;  %v117_v48 = vmul.f32 %v303_v15, %v97_v41  ;;  %v85_v49 = vadd.f32 %v230_v43, %v198_v42  ;;  %v202_v53 = vunpack.c.h.bf16 %v250_v31 }
   0xc   :  { %134 = vadd.xlane.f32.xlu1 %v116_v34  ;;  %v100_v52 = vmax.f32 %v84_v45, 0.0  ;;  %v234_v54 = vunpack.c.h.bf16 %v257_v32  ;;  %v206_v56 = vunpack.c.h.bf16 %v251_v50  ;;  %v238_v57 = vunpack.c.h.bf16 %v258_v51 }
   0xd   :  { %v102_v55 = vmax.f32 %v86_v47, 0.0  ;;  %v101_v58 = vmax.f32 %v85_v49, 0.0  ;;  %v205_v59 = vunpack.c.l.bf16 %v251_v50  ;;  %v237_v60 = vunpack.c.l.bf16 %v258_v51 }
   0xe   :  { %v120_v61 = vmul.f32 %v303_v15, %v100_v52  ;;  %v87_v62 = vadd.f32 %v234_v54, %v202_v53  ;;  %v89_v0 = vadd.f32 %v238_v57, %v206_v56  ;;  %v209_v8 = vunpack.c.l.bf16 %v252_v1 }
   0xf   :  { %v122_v63 = vmul.f32 %v303_v15, %v102_v55  ;;  %v121_v3 = vmul.f32 %v303_v15, %v101_v58  ;;  %v88_v4 = vadd.f32 %v237_v60, %v205_v59  ;;  %v241_v9 = vunpack.c.l.bf16 %v259_v2 }
  0x10   :  { %v103_v7 = vmax.f32 %v87_v62, 0.0  ;;  %v105_v10 = vmax.f32 %v89_v0, 0.0  ;;  %v213_v11 = vunpack.c.l.bf16 %v253_v5  ;;  %v245_v12 = vunpack.c.l.bf16 %v260_v6 }
  0x11   :  { %v104_v13 = vmax.f32 %v88_v4, 0.0  ;;  %v210_v14 = vunpack.c.h.bf16 %v252_v1  ;;  %v242_v16 = vunpack.c.h.bf16 %v259_v2  ;;  %v90_v18 = vadd.f32 %v241_v9, %v209_v8 }
  0x12   :  { %v123_v17 = vmul.f32 %v303_v15, %v103_v7  ;;  %v125_v19 = vmul.f32 %v303_v15, %v105_v10  ;;  %v92_v20 = vadd.f32 %v245_v12, %v213_v11  ;;  %v214_v24 = vunpack.c.h.bf16 %v253_v5 }
  0x13   :  { %132 = vadd.xlane.f32.xlu0 %v115_v44  ;;  %140 = vadd.xlane.f32.xlu2 %v119_v46  ;;  %v124_v21 = vmul.f32 %v303_v15, %v104_v13  ;;  %v91_v22 = vadd.f32 %v242_v16, %v210_v14  ;;  %v106_v23 = vmax.f32 %v90_v18, 0.0  ;;  %v246_v25 = vunpack.c.h.bf16 %v260_v6 }
  0x14   :  { %136 = vadd.xlane.f32.xlu1 %v117_v48  ;;  %v108_v26 = vmax.f32 %v92_v20, 0.0 }
  0x15   :  { %v107_v27 = vmax.f32 %v91_v22, 0.0  ;;  %v126_v28 = vmul.f32 %v303_v15, %v106_v23  ;;  %v93_v29 = vadd.f32 %v246_v25, %v214_v24 }
  0x16   :  { %v128_v30 = vmul.f32 %v303_v15, %v108_v26 }
  0x17   :  { %v127_v31 = vmul.f32 %v303_v15, %v107_v27  ;;  %v109_v32 = vmax.f32 %v93_v29, 0.0 }
  0x19   :  { %v129_v33 = vmul.f32 %v303_v15, %v109_v32 }
  0x1b   :  { %142 = vadd.xlane.f32.xlu0 %v120_v61  ;;  %146 = vadd.xlane.f32.xlu2 %v122_v63 }
  0x1c   :  { %144 = vadd.xlane.f32.xlu1 %v121_v3 }
  0x23   :  { %148 = vadd.xlane.f32.xlu0 %v123_v17  ;;  %152 = vadd.xlane.f32.xlu2 %v125_v19 }
  0x24   :  { %150 = vadd.xlane.f32.xlu1 %v124_v21 }
  0x2b   :  { %154 = vadd.xlane.f32.xlu0 %v126_v28  ;;  %158 = vadd.xlane.f32.xlu2 %v128_v30 }
  0x2c   :  { %156 = vadd.xlane.f32.xlu1 %v127_v31 }
  0x33   :  { %160 = vadd.xlane.f32.xlu0 %v129_v33 }
  0x7e   :  { %v131_v34 = vpop.xlane.xlu0 %130  ;;  %v139_v35 = vpop.xlane.xlu2 %138 }
  0x7f   :  { %163 = vst.msk [vmem:[%s418_s3] sm:$0xff] %vm162_vm0, %v131_v34  ;;  %v135_v36 = vpop.xlane.xlu1 %134 }
  0x80   :  { %167 = vst.msk [vmem:[%s418_s3 + $0x20] sm:$0xff] %vm162_vm0, %v139_v35 }
  0x81   :  { %165 = vst.msk [vmem:[%s418_s3 + $0x10] sm:$0xff] %vm162_vm0, %v135_v36 }
  0x86   :  { %v133_v15 = vpop.xlane.xlu0 %132  ;;  %v141_v37 = vpop.xlane.xlu2 %140 }
  0x87   :  { %164 = vst.msk [vmem:[%s418_s3 + $0x8] sm:$0xff] %vm162_vm0, %v133_v15  ;;  %v137_v38 = vpop.xlane.xlu1 %136 }
  0x88   :  { %168 = vst.msk [vmem:[%s418_s3 + $0x28] sm:$0xff] %vm162_vm0, %v141_v37 }
  0x89   :  { %166 = vst.msk [vmem:[%s418_s3 + $0x18] sm:$0xff] %vm162_vm0, %v137_v38 }
  0x8e   :  { %v143_v39 = vpop.xlane.xlu0 %142  ;;  %v147_v40 = vpop.xlane.xlu2 %146 }
  0x8f   :  { %169 = vst.msk [vmem:[%s418_s3 + $0x30] sm:$0xff] %vm162_vm0, %v143_v39  ;;  %v145_v41 = vpop.xlane.xlu1 %144 }
  0x90   :  { %171 = vst.msk [vmem:[%s418_s3 + $0x40] sm:$0xff] %vm162_vm0, %v147_v40 }
  0x91   :  { %170 = vst.msk [vmem:[%s418_s3 + $0x38] sm:$0xff] %vm162_vm0, %v145_v41 }
  0x96   :  { %v149_v42 = vpop.xlane.xlu0 %148  ;;  %v153_v43 = vpop.xlane.xlu2 %152 }
  0x97   :  { %172 = vst.msk [vmem:[%s418_s3 + $0x48] sm:$0xff] %vm162_vm0, %v149_v42  ;;  %v151_v44 = vpop.xlane.xlu1 %150 }
  0x98   :  { %174 = vst.msk [vmem:[%s418_s3 + $0x58] sm:$0xff] %vm162_vm0, %v153_v43 }
  0x99   :  { %173 = vst.msk [vmem:[%s418_s3 + $0x50] sm:$0xff] %vm162_vm0, %v151_v44 }
  0x9e   :  { %v155_v45 = vpop.xlane.xlu0 %154  ;;  %v159_v46 = vpop.xlane.xlu2 %158 }
  0x9f   :  { %175 = vst.msk [vmem:[%s418_s3 + $0x60] sm:$0xff] %vm162_vm0, %v155_v45  ;;  %v157_v47 = vpop.xlane.xlu1 %156 }
  0xa0   :  { %177 = vst.msk [vmem:[%s418_s3 + $0x70] sm:$0xff] %vm162_vm0, %v159_v46 }
  0xa1   :  { %176 = vst.msk [vmem:[%s418_s3 + $0x68] sm:$0xff] %vm162_vm0, %v157_v47 }
  0xa6   :  { %v161_v48 = vpop.xlane.xlu0 %160 }
  0xa7   :  { %178 = vst.msk [vmem:[%s418_s3 + $0x78] sm:$0xff] %vm162_vm0, %v161_v48 }

// kernel: _forward_core.3
= control target key start
LH: loop header
LB: loop body
LE: loop exit
PB: predicated region body
PF: predicated region fallthrough
CT: control target
= control target key end

     0   :  { %18 = vsyncpa [#allocation3], 0  ;;  %s1090_s0 = inlined_call_operand.vmem [shape: bf16[32,128], index: 0, kind: input, shape index: {}]   ;;  %s1091_s1 = inlined_call_operand.vmem [shape: bf16[128,128], index: 1, kind: input, shape index: {}]   ;;  %s1092_s2 = inlined_call_operand.vmem [shape: f32[1,128], index: 2, kind: input, shape index: {}]   ;;  %s1093_s3 = inlined_call_operand.vmem [shape: bf16[128,128], index: 3, kind: input, shape index: {}]   ;;  %s1094_s4 = inlined_call_operand.hbm [shape: bf16[128,128], index: 4, kind: input, shape index: {}]   ;;  %s1095_s5 = inlined_call_operand.hbm [shape: bf16[128,128], index: 5, kind: input, shape index: {}]   ;;  %s1096_s6 = inlined_call_operand.hbm [shape: bf16[128,128], index: 6, kind: input, shape index: {}]   ;;  %s1097_s7 = inlined_call_operand.vmem [shape: f32[1,128], index: 7, kind: input, shape index: {}]   ;;  %s1098_s8 = inlined_call_operand.vmem [shape: f32[1,128], index: 8, kind: input, shape index: {}]   ;;  %s1099_s9 = inlined_call_operand.vmem [shape: bf16[32,128], index: 9, kind: output, shape index: {0}]   ;;  %s1100_s10 = inlined_call_operand.vmem [shape: bf16[32,128], index: 10, kind: output, shape index: {1}]   ;;  %s1101_s11 = inlined_call_operand.vmem [shape: bf16[32,128], index: 11, kind: output, shape index: {2}]   ;;  %s1102_s12 = inlined_call_operand.vmem [shape: bf16[32,128], index: 12, kind: output, shape index: {3}]  }
   0x1   :  { %19 = vsyncpa [#allocation5], 0  ;;  %s45_s23 = sshll.u32 %s1095_s5, 4  ;;  %s924_s24 = smov [#allocation4]   ;;  %s46_s23 = int_to_ptr.hbm [resolvable:$true] %s45_s23 }
   0x2   :  { %s47_s25 = sshll.u32 %s924_s24, 4  ;;  %s32_s28 = sshll.u32 %s1094_s4, 4  ;;  %s48_s25 = int_to_ptr.vmem [resolvable:$true] %s47_s25  ;;  %s33_s28 = int_to_ptr.hbm [resolvable:$true] %s32_s28 }
   0x3   :  { %s925_s29 = smov 64   ;;  %s926_s30 = smov 4  }
   0x4   :  { %53 = dma.hbm_to_vmem [thread:$0]  %s46_s23, 1024, %s48_s25, [#allocation5], %s925_s29, %s925_s29, %s926_s30  }
   0x5   :  { %s927_s13 = smov [#allocation2]   ;;  %s58_s17 = sshll.u32 %s1096_s6, 4  ;;  %s59_s17 = int_to_ptr.hbm [resolvable:$true] %s58_s17 }
   0x6   :  { %s34_s14 = sshll.u32 %s927_s13, 4  ;;  %s928_s5 = smov [#allocation6]   ;;  %s35_s14 = int_to_ptr.vmem [resolvable:$true] %s34_s14 }
   0x7   :  { %40 = dma.hbm_to_vmem [thread:$0]  %s33_s28, 1024, %s35_s14, [#allocation3], %s925_s29, %s925_s29, %s926_s30  }
   0x8   :  { %s60_s18 = sshll.u32 %s928_s5, 4  ;;  %s61_s18 = int_to_ptr.vmem [resolvable:$true] %s60_s18 }
   0x9   :  { %66 = dma.hbm_to_vmem [thread:$0]  %s59_s17, 1024, %s61_s18, [#allocation5], %s925_s29, %s925_s29, %s926_s30  }
   0xa   :  { %920 = dma.done.wait [#allocation3], 1024  }
   0xb   :  { %921 = vsyncadd [#allocation3], 4294966272 }
   0xc   :  { %922 = dma.done.wait [#allocation5], 2048  }
   0xd   :  { %923 = vsyncadd [#allocation5], 4294965248  ;;  %v755_v0 = vld [vmem:[%s1091_s1 + $0x38] sm:$0xff]  ;;  %v754_v1 = vld [vmem:[%s1091_s1 + $0x30] sm:$0xff] }
   0xe   :  { %167 = vmatpush.bf16.msra.mxu0 %v755_v0  ;;  %v753_v2 = vld [vmem:[%s1091_s1 + $0x28] sm:$0xff]  ;;  %v752_v3 = vld [vmem:[%s1091_s1 + $0x20] sm:$0xff]  ;;  %v751_v4 = vld [vmem:[%s1091_s1 + $0x18] sm:$0xff] }
   0xf   :  { %v763_v5 = vld [vmem:[%s1093_s3 + $0x38] sm:$0xff]  ;;  %v750_v8 = vld [vmem:[%s1091_s1 + $0x10] sm:$0xff]  ;;  %v749_v12 = vld [vmem:[%s1091_s1 + $0x8] sm:$0xff] }
  0x10   :  { %v771_v6 = vld [vmem:[#allocation2 + $0x38] sm:$0xff]  ;;  %256 = vmatpush.bf16.msra.mxu1 %v763_v5  ;;  %v762_v9 = vld [vmem:[%s1093_s3 + $0x30] sm:$0xff]  ;;  %v761_v13 = vld [vmem:[%s1093_s3 + $0x28] sm:$0xff] }
  0x11   :  { %v779_v7 = vld [vmem:[#allocation4 + $0x38] sm:$0xff]  ;;  %339 = vmatpush.bf16.msra.mxu2 %v771_v6  ;;  %v770_v10 = vld [vmem:[#allocation2 + $0x30] sm:$0xff]  ;;  %v769_v14 = vld [vmem:[#allocation2 + $0x28] sm:$0xff] }
  0x12   :  { %168 = vmatpush.bf16.msra.mxu0 %v754_v1  ;;  %426 = vmatpush.bf16.msra.mxu3 %v779_v7  ;;  %v778_v11 = vld [vmem:[#allocation4 + $0x30] sm:$0xff]  ;;  %v777_v15 = vld [vmem:[#allocation4 + $0x28] sm:$0xff]  ;;  %v748_v16 = vld [vmem:[%s1091_s1] sm:$0xff] }
  0x13   :  { %v787_v17 = vld [vmem:[#allocation6 + $0x38] sm:$0xff]  ;;  %v760_v18 = vld [vmem:[%s1093_s3 + $0x20] sm:$0xff]  ;;  %v786_v22 = vld [vmem:[#allocation6 + $0x30] sm:$0xff] }
  0x14   :  { %257 = vmatpush.bf16.msra.mxu1 %v762_v9  ;;  %v768_v19 = vld [vmem:[#allocation2 + $0x20] sm:$0xff]  ;;  %v759_v23 = vld [vmem:[%s1093_s3 + $0x18] sm:$0xff]  ;;  %v785_v26 = vld [vmem:[#allocation6 + $0x28] sm:$0xff] }
  0x15   :  { %340 = vmatpush.bf16.msra.mxu2 %v770_v10  ;;  %v776_v20 = vld [vmem:[#allocation4 + $0x20] sm:$0xff]  ;;  %v767_v24 = vld [vmem:[#allocation2 + $0x18] sm:$0xff]  ;;  %v747_v29 = vld [vmem:[%s1090_s0 + $0x8] sm:$0xff] }
  0x16   :  { %169 = vmatpush.bf16.msra.mxu0 %v753_v2  ;;  %427 = vmatpush.bf16.msra.mxu3 %v778_v11  ;;  %v746_v21 = vld [vmem:[%s1090_s0] sm:$0xff]  ;;  %v775_v25 = vld [vmem:[#allocation4 + $0x18] sm:$0xff]  ;;  %v758_v30 = vld [vmem:[%s1093_s3 + $0x10] sm:$0xff] }
  0x17   :  { %v784_v27 = vld [vmem:[#allocation6 + $0x20] sm:$0xff]  ;;  %v783_v28 = vld [vmem:[#allocation6 + $0x18] sm:$0xff]  ;;  %v766_v31 = vld [vmem:[#allocation2 + $0x10] sm:$0xff] }
  0x18   :  { %258 = vmatpush.bf16.msra.mxu1 %v761_v13  ;;  %v774_v32 = vld [vmem:[#allocation4 + $0x10] sm:$0xff]  ;;  %v757_v34 = vld [vmem:[%s1093_s3 + $0x8] sm:$0xff]  ;;  %v756_v38 = vld [vmem:[%s1093_s3] sm:$0xff] }
  0x19   :  { %341 = vmatpush.bf16.msra.mxu2 %v769_v14  ;;  %v782_v33 = vld [vmem:[#allocation6 + $0x10] sm:$0xff]  ;;  %v765_v35 = vld [vmem:[#allocation2 + $0x8] sm:$0xff]  ;;  %v764_v39 = vld [vmem:[#allocation2] sm:$0xff] }
  0x1a   :  { %170 = vmatpush.bf16.msra.mxu0 %v752_v3  ;;  %428 = vmatpush.bf16.msra.mxu3 %v777_v15  ;;  %v773_v36 = vld [vmem:[#allocation4 + $0x8] sm:$0xff]  ;;  %v772_v40 = vld [vmem:[#allocation4] sm:$0xff] }
  0x1b   :  { %v781_v37 = vld [vmem:[#allocation6 + $0x8] sm:$0xff]  ;;  %v780_v41 = vld [vmem:[#allocation6] sm:$0xff] }
  0x1c   :  { %259 = vmatpush.bf16.msra.mxu1 %v760_v18  ;;  %v845_v43 = vld [vmem:[%s1092_s2] ss:$0 sm:$0xff] }
  0x1d   :  { %342 = vmatpush.bf16.msra.mxu2 %v768_v19  ;;  %v846_v55 = vld [vmem:[%s1097_s7] ss:$0 sm:$0xff] }
  0x1e   :  { %171 = vmatpush.bf16.msra.mxu0 %v751_v4  ;;  %429 = vmatpush.bf16.msra.mxu3 %v776_v20  ;;  %v847_v0 = vld [vmem:[%s1098_s8] ss:$0 sm:$0xff] }
  0x20   :  { %260 = vmatpush.bf16.msra.mxu1 %v759_v23 }
  0x21   :  { %343 = vmatpush.bf16.msra.mxu2 %v767_v24 }
  0x22   :  { %172 = vmatpush.bf16.msra.mxu0 %v750_v8  ;;  %430 = vmatpush.bf16.msra.mxu3 %v775_v25 }
  0x24   :  { %261 = vmatpush.bf16.msra.mxu1 %v758_v30 }
  0x25   :  { %344 = vmatpush.bf16.msra.mxu2 %v766_v31 }
  0x26   :  { %173 = vmatpush.bf16.msra.mxu0 %v749_v12  ;;  %431 = vmatpush.bf16.msra.mxu3 %v774_v32 }
  0x28   :  { %262 = vmatpush.bf16.msra.mxu1 %v757_v34 }
  0x29   :  { %345 = vmatpush.bf16.msra.mxu2 %v765_v35 }
  0x2a   :  { %174 = vmatpush.bf16.msra.mxu0 %v748_v16  ;;  %432 = vmatpush.bf16.msra.mxu3 %v773_v36 }
  0x2c   :  { %263 = vmatpush.bf16.msra.mxu1 %v756_v38 }
  0x2d   :  { %175 = vmatmul.bf16.vlgmr.msra.gmra.mxu0 %v746_v21  ;;  %346 = vmatpush.bf16.msra.mxu2 %v764_v39 }
  0x2e   :  { %509 = vmatpush.bf16.msrb.mxu0 %v787_v17  ;;  %433 = vmatpush.bf16.msra.mxu3 %v772_v40 }
  0x30   :  { %832 = vmatpush.bf16.msrb.mxu1 %v787_v17 }
  0x32   :  { %510 = vmatpush.bf16.msrb.mxu0 %v786_v22 }
  0x34   :  { %833 = vmatpush.bf16.msrb.mxu1 %v786_v22 }
  0x36   :  { %511 = vmatpush.bf16.msrb.mxu0 %v785_v26 }
  0x38   :  { %834 = vmatpush.bf16.msrb.mxu1 %v785_v26 }
  0x3a   :  { %512 = vmatpush.bf16.msrb.mxu0 %v784_v27 }
  0x3c   :  { %835 = vmatpush.bf16.msrb.mxu1 %v784_v27 }
  0x3d   :  { %180 = vmatmul.bf16.gmra.mxu0 %v747_v29 }
  0x3e   :  { %513 = vmatpush.bf16.msrb.mxu0 %v783_v28 }
  0x40   :  { %836 = vmatpush.bf16.msrb.mxu1 %v783_v28 }
  0x42   :  { %514 = vmatpush.bf16.msrb.mxu0 %v782_v33 }
  0x44   :  { %837 = vmatpush.bf16.msrb.mxu1 %v782_v33 }
  0x46   :  { %515 = vmatpush.bf16.msrb.mxu0 %v781_v37 }
  0x48   :  { %838 = vmatpush.bf16.msrb.mxu1 %v781_v37 }
  0x4a   :  { %516 = vmatpush.bf16.msrb.mxu0 %v780_v41 }
  0x4c   :  { %839 = vmatpush.bf16.msrb.mxu1 %v780_v41 }
  0xaa   :  { %v176_v42 = vpop.f32.mrf.mxu0 }
  0xab   :  { %v177_v45 = vadd.f32 %v845_v43, %v176_v42 }
  0xb2   :  { %v178_v44 = vpop.f32.mrf.mxu0 }
  0xb3   :  { %v179_v46 = vadd.f32 %v845_v43, %v178_v44 }
  0xb5   :  { %v186_v47 = vpack.c.bf16 %v179_v46, %v177_v45 }
  0xb7   :  { %264 = vmatmul.bf16.vlgmr.msra.gmra.mxu1 %v186_v47  ;;  %347 = vmatmul.bf16.vlgmr.msra.gmra.mxu2 %v186_v47 }
  0xb8   :  { %434 = vmatmul.bf16.vlgmr.msra.gmra.mxu3 %v186_v47  ;;  %517 = vmatmul.bf16.vlgmr.msrb.gmra.mxu0 %v186_v47 }
  0xba   :  { %v181_v48 = vpop.f32.mrf.mxu0 }
  0xbb   :  { %v182_v50 = vadd.f32 %v845_v43, %v181_v48 }
  0xc2   :  { %v183_v49 = vpop.f32.mrf.mxu0 }
  0xc3   :  { %v184_v51 = vadd.f32 %v845_v43, %v183_v49 }
  0xc5   :  { %v187_v52 = vpack.c.bf16 %v184_v51, %v182_v50 }
  0xc7   :  { %269 = vmatmul.bf16.gmra.mxu1 %v187_v52  ;;  %352 = vmatmul.bf16.gmra.mxu2 %v187_v52 }
  0xc8   :  { %439 = vmatmul.bf16.gmra.mxu3 %v187_v52 }
  0xd7   :  { %522 = vmatmul.bf16.vlgmr.msrb.gmra.mxu1 %v187_v52 }
 0x134   :  { %v265_v53 = vpop.f32.mrf.mxu1 }
 0x135   :  { %v518_v54 = vpop.f32.mrf.mxu0  ;;  %v266_v59 = vadd.f32 %v846_v55, %v265_v53 }
 0x13a   :  { %v348_v56 = vpop.f32.mrf.mxu2 }
 0x13b   :  { %v435_v57 = vpop.f32.mrf.mxu3 }
 0x13c   :  { %v267_v58 = vpop.f32.mrf.mxu1  ;;  %v436_v4 = vadd.f32 %v847_v0, %v435_v57 }
 0x13d   :  { %v268_v60 = vadd.f32 %v846_v55, %v267_v58  ;;  %v520_v61 = vpop.f32.mrf.mxu0 }
 0x13e   :  { %v821_v62 = vpack.c.bf16 %v520_v61, %v518_v54 }
 0x13f   :  { %v791_v63 = vpack.c.bf16 %v268_v60, %v266_v59 }
 0x140   :  { %822 = vst [vmem:[%s1102_s12] sm:$0xff] %v821_v62  }
 0x141   :  { %792 = vst [vmem:[%s1099_s9] sm:$0xff] %v791_v63  }
 0x142   :  { %v350_v1 = vpop.f32.mrf.mxu2 }
 0x143   :  { %v801_v2 = vpack.c.bf16 %v350_v1, %v348_v56  ;;  %v437_v3 = vpop.f32.mrf.mxu3 }
 0x144   :  { %v438_v5 = vadd.f32 %v847_v0, %v437_v3  ;;  %v270_v6 = vpop.f32.mrf.mxu1 }
 0x145   :  { %802 = vst [vmem:[%s1100_s10] sm:$0xff] %v801_v2   ;;  %v271_v11 = vadd.f32 %v846_v55, %v270_v6 }
 0x146   :  { %v811_v7 = vpack.c.bf16 %v438_v5, %v436_v4 }
 0x148   :  { %812 = vst [vmem:[%s1101_s11] sm:$0xff] %v811_v7  }
 0x14a   :  { %v353_v8 = vpop.f32.mrf.mxu2 }
 0x14b   :  { %v440_v9 = vpop.f32.mrf.mxu3 }
 0x14c   :  { %v272_v10 = vpop.f32.mrf.mxu1  ;;  %v441_v17 = vadd.f32 %v847_v0, %v440_v9 }
 0x14d   :  { %v273_v12 = vadd.f32 %v846_v55, %v272_v10 }
 0x14f   :  { %v796_v13 = vpack.c.bf16 %v273_v12, %v271_v11 }
 0x151   :  { %828 = vst [vmem:[%s1099_s9 + $0x8] sm:$0xff] %v796_v13  }
 0x152   :  { %v355_v14 = vpop.f32.mrf.mxu2 }
 0x153   :  { %v806_v15 = vpack.c.bf16 %v355_v14, %v353_v8  ;;  %v442_v16 = vpop.f32.mrf.mxu3 }
 0x154   :  { %v443_v18 = vadd.f32 %v847_v0, %v442_v16  ;;  %v523_v19 = vpop.f32.mrf.mxu1 }
 0x155   :  { %829 = vst [vmem:[%s1100_s10 + $0x8] sm:$0xff] %v806_v15  }
 0x156   :  { %v816_v20 = vpack.c.bf16 %v443_v18, %v441_v17 }
 0x158   :  { %830 = vst [vmem:[%s1101_s11 + $0x8] sm:$0xff] %v816_v20  }
 0x15c   :  { %v525_v21 = vpop.f32.mrf.mxu1 }
 0x15d   :  { %v826_v22 = vpack.c.bf16 %v525_v21, %v523_v19 }
 0x15f   :  { %831 = vst [vmem:[%s1102_s12 + $0x8] sm:$0xff] %v826_v22  }
 0x160   :  { %576 = vsyncpa [#allocation3], 1 }
 0x161   :  { %577 = vsyncpa [#allocation5], 1 }

</bundles_post_ra>
